<compile_context>
chip_gen: v7x
topology: tpu7x:2x2x1
jax: 0.10.0
libtpu: 0.0.40
codegen_flags: <defaults>
</compile_context>

<pallas_src>
import functools

import jax
import jax.numpy as jnp
from jax import lax
from jax.experimental import pallas as pl
from jax.experimental.pallas import tpu as pltpu

REAL_MIN = 2.2e-16
EULERGAMMA = 0.5772          # matches the torch module's (truncated) constant
_HALF_LOG_2PI = 0.9189385332046727


def _log_max(x):
    # torch.log(torch.max(x, real_min))
    return jnp.log(jnp.maximum(x, REAL_MIN))


def _gamma_1p(x):
    # Gamma(1 + x) for x > 0  ==  exp(torch.lgamma(1 + x)).
    # 4-step upward shift + Stirling series (rel. err << f32 eps for w >= 5).
    z = 1.0 + x
    w = z + 4.0
    u = 1.0 / w
    u2 = u * u
    series = u * (1.0 / 12.0 + u2 * (-1.0 / 360.0 + u2 * (1.0 / 1260.0)))
    lg_w = (w - 0.5) * jnp.log(w) - w + _HALF_LOG_2PI + series
    return jnp.exp(lg_w) / (z * (z + 1.0) * (z + 2.0) * (z + 3.0))


def _vae_elbo_kernel(x_ref, eps_ref, cwg_ref, wbd_ref, bias_ref, dwm_ref,
                     out_ref, *, sent_len):
    f32 = jnp.float32
    rows = x_ref.shape[0]
    hdim = eps_ref.shape[1]

    # ---- encoder: Conv2d(2H, 2H, 1, groups=2) == ONE block-diagonal matmul ----
    wei = jnp.dot(x_ref[...], wbd_ref[...],
                  preferred_element_type=f32) + bias_ref[...]
    wei_shape = wei[:, :hdim]
    wei_scale = wei[:, hdim:]
    # NOTE: like the torch module, no positivity transform is applied here.
    inv_shape = 1.0 / wei_shape          # single EUP divide, reused everywhere

    # ---- KL(Gamma(1,1) || Weibull(shape, scale)), summed over this tile ----
    kl = (EULERGAMMA * (1.0 - inv_shape) + _log_max(wei_scale * inv_shape)
          + 1.0 - wei_scale * _gamma_1p(inv_shape))
    kl_part = jnp.sum(kl)

    # ---- Weibull reparameterization: theta never leaves VMEM ----
    # TODO(synk): torch draws eps in float64; we use float32 throughout.
    base = -_log_max(1.0 - eps_ref[...])
    theta = wei_scale * jnp.exp(jnp.log(base) * inv_shape)

    # ---- "same" (1,3) decoder-conv neighbors: XLU rolls + boundary masks ----
    # Tiles hold whole sentences, so the circular-wrap rows of the rolls are
    # exactly the rows masked by pos==0 / pos==L-1.
    pos = lax.broadcasted_iota(jnp.int32, (rows, 1), 0) % sent_len
    theta_prev = jnp.where(pos == 0, 0.0, pltpu.roll(theta, shift=1, axis=0))
    theta_next = jnp.where(pos == sent_len - 1, 0.0,
                           pltpu.roll(theta, shift=rows - 1, axis=0))

    # ---- Poisson likelihood with phi [rows, V] eliminated algebraically ----
    # lgamma(Orgin_X + 1) == 0 exactly since Orgin_X is in {0, 1}.
    cwg = cwg_ref[...]                                   # gathered decoder rows
    phi_at_label = jnp.sum(theta_prev * cwg[:, :hdim]
                           + theta * cwg[:, hdim:2 * hdim]
                           + theta_next * cwg[:, 2 * hdim:],
                           axis=1, keepdims=True)
    dwm = dwm_ref[...]                                   # vocab-masked decoder sums
    phi_mass = jnp.sum(theta_prev * dwm[:, :hdim]
                       + theta * dwm[:, hdim:2 * hdim]
                       + theta_next * dwm[:, 2 * hdim:])
    lik_part = jnp.sum(_log_max(phi_at_label)) - phi_mass

    # ---- lane-dense per-tile partials: lane0 = KL, lane1 = Likelihood ----
    sub = lax.broadcasted_iota(jnp.int32, (1, 8, 128), 1)
    lane = lax.broadcasted_iota(jnp.int32, (1, 8, 128), 2)
    row0 = sub == 0
    out_ref[...] = (jnp.where(row0 & (lane == 0), kl_part, 0.0)
                    + jnp.where(row0 & (lane == 1), lik_part, 0.0))


def _vmem_budget_bytes():
    cap = 64 * 1024 * 1024
    try:
        cap = int(pltpu.get_tpu_info().vmem_capacity_bytes)
    except Exception:
        pass
    # ~25% headroom: 48 MiB on v7x's 64 MiB, 96 MiB on v5e/v6e's 128 MiB.
    return int(max(32 << 20, min((cap * 3) // 4, 100 << 20)))


def _pick_seqs_per_tile(n_seq, sent_len, hdim, budget_bytes):
    lane_pad = lambda w: ((w + 127) // 128) * 128
    # streamed per-row bytes (x, eps, gathered weights), f32, double-buffered
    stream_bpr = 4 * (lane_pad(2 * hdim) + lane_pad(hdim) + lane_pad(3 * hdim)) * 2
    # rough in-kernel live f32 values (wei, theta, shifted thetas, products)
    scratch_bpr = 4 * 8 * lane_pad(hdim)
    resident = 2 * (4 * 2 * hdim * lane_pad(2 * hdim)      # encoder weight
                    + 4 * lane_pad(2 * hdim)               # bias
                    + 4 * lane_pad(3 * hdim)               # dwm
                    + 4 * 8 * 128)                         # output tile
    max_rows = max(sent_len, (budget_bytes - resident) // (stream_bpr + scratch_bpr))

    cands = [d for d in range(1, n_seq + 1)
             if n_seq % d == 0 and (d * sent_len) % 8 == 0]
    if not cands:
        # TODO(synk): would need sent-len padding for odd B*S*L combinations.
        raise ValueError("no 8-row-aligned whole-sentence tiling exists")
    fits = [d for d in cands if d * sent_len <= max_rows] or [min(cands)]
    tiles = lambda d: n_seq // d
    # keep the grid >= 2 steps and a multiple of 2 (megacore), ideally 4-16 steps
    pref = ([d for d in fits if tiles(d) % 2 == 0 and 4 <= tiles(d) <= 16]
            or [d for d in fits if tiles(d) % 2 == 0 and tiles(d) >= 2]
            or [d for d in fits if tiles(d) >= 2]
            or fits)
    return max(pref)


def vae_elbo_loss(scores, label, W, origin_data, cnn_weight,
                  shape_scale_w, shape_scale_b, eps, *, seqs_per_tile=None):
    """
    scores:        [B, C]          logits
    label:         [B, C]          argmax(-1) gives the class (as in torch)
    W:             [S, L, B, 2H]   feature map (same as VAELoss.forward input)
    origin_data:   [B, S, L] int32 vocab indices
    cnn_weight:    [V, 3, H]       decoder kernel (the numpy arg of forward)
    shape_scale_w: [2H, H, 1, 1]   Conv2d(2H, 2H, 1, groups=2) weight
    shape_scale_b: [2H]            its bias
    eps:           [B*S*L, H]      uniform(0,1) noise, rows ordered (b, s, l)
    """
    S, L, B, twoH = W.shape
    H = twoH // 2
    V = int(cnn_weight.shape[0])
    n_seq = B * S
    N = n_seq * L
    f32 = jnp.float32

    # ---- layout plumbing: rows ordered (b, s, l) so every tile holds whole
    # sentences and the (1,3) conv never crosses a tile boundary ----
    x = jnp.transpose(W, (2, 0, 1, 3)).reshape(N, twoH).astype(f32)
    eps = eps.reshape(N, H).astype(f32)

    # grouped 1x1 conv == one block-diagonal matmul
    w1t = jnp.transpose(shape_scale_w[:H, :, 0, 0]).astype(f32)
    w2t = jnp.transpose(shape_scale_w[H:, :, 0, 0]).astype(f32)
    wbd = jnp.zeros((twoH, twoH), f32).at[:H, :H].set(w1t).at[H:, H:].set(w2t)
    bias = jnp.reshape(shape_scale_b.astype(f32), (1, twoH))

    # decoder-weight pre-processing that removes the [rows, V] phi entirely:
    #   cwg[r] = cnn_weight[origin[r]]      -> per-row log(phi_at_label)
    #   dwm    = vocab_mask . cnn_weight    -> sum(phi over torch.unique vocab)
    cw = jnp.asarray(cnn_weight, f32)                        # [V, 3, H]
    origin_flat = origin_data.reshape(N).astype(jnp.int32)
    cwg = jnp.take(cw, origin_flat, axis=0).reshape(N, 3 * H)
    vmask = jnp.zeros((V,), f32).at[origin_flat].set(1.0)    # torch.unique membership
    dwm = jnp.einsum("v,vkh->kh", vmask, cw).reshape(1, 3 * H)

    budget = _vmem_budget_bytes()
    if seqs_per_tile is None:
        d = _pick_seqs_per_tile(n_seq, L, H, budget)
    else:
        d = int(seqs_per_tile)
        if n_seq % d or (d * L) % 8:
            raise ValueError("seqs_per_tile must divide B*S and give 8-row-aligned tiles")
    T = d * L
    num_tiles = n_seq // d

    kernel = functools.partial(_vae_elbo_kernel, sent_len=L)
    partials = pl.pallas_call(
        kernel,
        out_shape=jax.ShapeDtypeStruct((num_tiles, 8, 128), jnp.float32),
        grid=(num_tiles,),
        in_specs=[
            pl.BlockSpec((T, twoH), lambda i: (i, 0)),      # x        (streamed)
            pl.BlockSpec((T, H), lambda i: (i, 0)),         # eps      (streamed)
            pl.BlockSpec((T, 3 * H), lambda i: (i, 0)),     # gathered decoder rows
            pl.BlockSpec((twoH, twoH), lambda i: (0, 0)),   # encoder weight (resident)
            pl.BlockSpec((1, twoH), lambda i: (0, 0)),      # encoder bias
            pl.BlockSpec((1, 3 * H), lambda i: (0, 0)),     # vocab-masked decoder sums
        ],
        out_specs=pl.BlockSpec((1, 8, 128), lambda i: (i, 0, 0)),
        compiler_params=pltpu.CompilerParams(
            dimension_semantics=("parallel",),              # megacore on v7x
            vmem_limit_bytes=budget),
    )(x, eps, cwg, wbd, bias, dwm)

    p = jnp.sum(partials, axis=(0, 1))          # lane0 = KL, lane1 = Likelihood
    kl_loss, likelihood = p[0], p[1]

    # F.cross_entropy(scores, argmax(label, -1)) on the tiny [B, C] pair: plain XLA.
    s = scores.astype(f32)
    tgt = jnp.argmax(label, axis=-1)
    smax = jnp.max(s, axis=-1, keepdims=True)
    lse = jnp.log(jnp.sum(jnp.exp(s - smax), axis=-1)) + smax[:, 0]
    picked = jnp.take_along_axis(s, tgt[:, None], axis=1)[:, 0]
    ce_loss = jnp.mean(lse - picked)

    return ce_loss - likelihood + kl_loss       # Loss = CE - Likelihood + KL


if __name__ == "__main__":
    # config: word_num_hidden=16 (2H=32), vae_word_dim=32, label_smoothing=False
    # TODO(synk): LabelSmoothing branch not provided upstream; plain CE path used.
    B, S, L, H, V, C = 2, 4, 8, 16, 32, 4
    key = jax.random.PRNGKey(0)
    ks = jax.random.split(key, 8)
    # positive-valued init keeps Wei_shape/Wei_scale/theta in the valid domain
    # of the Weibull/Gamma formulas (the torch module applies no transform).
    W = jax.random.uniform(ks[0], (S, L, B, 2 * H), jnp.float32, 0.1, 1.0)
    scores = jax.random.normal(ks[1], (B, C), jnp.float32)
    label = jax.random.uniform(ks[2], (B, C), jnp.float32)
    origin = jax.random.randint(ks[3], (B, S, L), 0, V, jnp.int32)
    cnn_weight = jax.random.uniform(ks[4], (V, 3, H), jnp.float32, 0.0, 0.1)
    ss_w = jax.random.uniform(ks[5], (2 * H, H, 1, 1), jnp.float32, 0.01, 0.2)
    ss_b = jax.random.uniform(ks[6], (2 * H,), jnp.float32, 0.1, 0.5)
    eps = jax.random.uniform(ks[7], (B * S * L, H), jnp.float32)

    loss_fn = jax.jit(vae_elbo_loss, static_argnames=("seqs_per_tile",))
    # auto tile chooser -> 4 tiles of 2 sentences (16 rows) each at these shapes
    loss = loss_fn(scores, label, W, origin, cnn_weight, ss_w, ss_b, eps)
    jax.block_until_ready(loss)
    assert jnp.isfinite(loss), loss
    print("KERNEL_OK")
</pallas_src>

<mosaic_0001>
module attributes {stable_mosaic.version = 11 : i64} {
  func.func @_vae_elbo_kernel(%arg0: i32, %arg1: memref<16x32xf32, #tpu.memory_space<vmem>>, %arg2: memref<16x16xf32, #tpu.memory_space<vmem>>, %arg3: memref<16x48xf32, #tpu.memory_space<vmem>>, %arg4: memref<32x32xf32, #tpu.memory_space<vmem>>, %arg5: memref<1x32xf32, #tpu.memory_space<vmem>>, %arg6: memref<1x48xf32, #tpu.memory_space<vmem>>, %arg7: memref<1x8x128xf32, #tpu.memory_space<vmem>>) attributes {dimension_semantics = [#tpu.dimension_semantics<parallel>], iteration_bounds = array<i64: 4>, scalar_prefetch = 0 : i64, scratch_operands = 0 : i64, tpu.core_type = #tpu.core_type<tc>, window_params = [{transform_indices = @transform_0, window_bounds = array<i64: 16, 32>}, {transform_indices = @transform_1, window_bounds = array<i64: 16, 16>}, {transform_indices = @transform_2, window_bounds = array<i64: 16, 48>}, {pipeline_mode = #tpu.pipeline_mode<synchronous>, transform_indices = @transform_3, window_bounds = array<i64: 32, 32>}, {pipeline_mode = #tpu.pipeline_mode<synchronous>, transform_indices = @transform_4, window_bounds = array<i64: 1, 32>}, {pipeline_mode = #tpu.pipeline_mode<synchronous>, transform_indices = @transform_5, window_bounds = array<i64: 1, 48>}, {transform_indices = @transform_6, window_bounds = array<i64: 1, 8, 128>}]} {
    %c0 = arith.constant 0 : index
    %c0_0 = arith.constant 0 : index
    %0 = vector.load %arg1[%c0, %c0_0] : memref<16x32xf32, #tpu.memory_space<vmem>>, vector<16x32xf32>
    %c0_1 = arith.constant 0 : index
    %c0_2 = arith.constant 0 : index
    %1 = vector.load %arg4[%c0_1, %c0_2] : memref<32x32xf32, #tpu.memory_space<vmem>>, vector<32x32xf32>
    %cst = arith.constant dense<0.000000e+00> : vector<16x32xf32>
    %2 = tpu.matmul %0, %1, %cst {dimension_numbers = #tpu.dot_dimension_numbers<[1], [0], [0], [1], [0, 0, 1, 1], [], []>} : vector<16x32xf32>, vector<32x32xf32>, vector<16x32xf32> -> vector<16x32xf32>
    %c0_3 = arith.constant 0 : index
    %c0_4 = arith.constant 0 : index
    %3 = vector.load %arg5[%c0_3, %c0_4] : memref<1x32xf32, #tpu.memory_space<vmem>>, vector<1x32xf32>
    %4 = vector.broadcast %3 : vector<1x32xf32> to vector<16x32xf32>
    %5 = arith.addf %2, %4 : vector<16x32xf32>
    %6 = vector.extract_strided_slice %5 {offsets = [0, 0], sizes = [16, 16], strides = [1, 1]} : vector<16x32xf32> to vector<16x16xf32>
    %7 = vector.extract_strided_slice %5 {offsets = [0, 16], sizes = [16, 16], strides = [1, 1]} : vector<16x32xf32> to vector<16x16xf32>
    %cst_5 = arith.constant 1.000000e+00 : f32
    %8 = vector.broadcast %cst_5 : f32 to vector<16x16xf32>
    %9 = arith.divf %8, %6 : vector<16x16xf32>
    %cst_6 = arith.constant 1.000000e+00 : f32
    %10 = vector.broadcast %cst_6 : f32 to vector<16x16xf32>
    %11 = arith.subf %10, %9 : vector<16x16xf32>
    %cst_7 = arith.constant 5.772000e-01 : f32
    %12 = vector.broadcast %cst_7 : f32 to vector<16x16xf32>
    %13 = arith.mulf %12, %11 : vector<16x16xf32>
    %14 = arith.mulf %7, %9 : vector<16x16xf32>
    %cst_8 = arith.constant 2.200000e-16 : f32
    %15 = vector.broadcast %cst_8 : f32 to vector<16x16xf32>
    %16 = arith.maximumf %14, %15 : vector<16x16xf32>
    %17 = math.log %16 : vector<16x16xf32>
    %18 = arith.addf %13, %17 : vector<16x16xf32>
    %cst_9 = arith.constant 1.000000e+00 : f32
    %19 = vector.broadcast %cst_9 : f32 to vector<16x16xf32>
    %20 = arith.addf %18, %19 : vector<16x16xf32>
    %cst_10 = arith.constant 1.000000e+00 : f32
    %21 = vector.broadcast %cst_10 : f32 to vector<16x16xf32>
    %22 = arith.addf %21, %9 : vector<16x16xf32>
    %cst_11 = arith.constant 4.000000e+00 : f32
    %23 = vector.broadcast %cst_11 : f32 to vector<16x16xf32>
    %24 = arith.addf %22, %23 : vector<16x16xf32>
    %cst_12 = arith.constant 1.000000e+00 : f32
    %25 = vector.broadcast %cst_12 : f32 to vector<16x16xf32>
    %26 = arith.divf %25, %24 : vector<16x16xf32>
    %27 = arith.mulf %26, %26 : vector<16x16xf32>
    %cst_13 = arith.constant 7.93650805E-4 : f32
    %28 = vector.broadcast %cst_13 : f32 to vector<16x16xf32>
    %29 = arith.mulf %27, %28 : vector<16x16xf32>
    %cst_14 = arith.constant -0.00277777785 : f32
    %30 = vector.broadcast %cst_14 : f32 to vector<16x16xf32>
    %31 = arith.addf %30, %29 : vector<16x16xf32>
    %32 = arith.mulf %27, %31 : vector<16x16xf32>
    %cst_15 = arith.constant 0.0833333358 : f32
    %33 = vector.broadcast %cst_15 : f32 to vector<16x16xf32>
    %34 = arith.addf %33, %32 : vector<16x16xf32>
    %35 = arith.mulf %26, %34 : vector<16x16xf32>
    %cst_16 = arith.constant 5.000000e-01 : f32
    %36 = vector.broadcast %cst_16 : f32 to vector<16x16xf32>
    %37 = arith.subf %24, %36 : vector<16x16xf32>
    %38 = math.log %24 : vector<16x16xf32>
    %39 = arith.mulf %37, %38 : vector<16x16xf32>
    %40 = arith.subf %39, %24 : vector<16x16xf32>
    %cst_17 = arith.constant 0.918938517 : f32
    %41 = vector.broadcast %cst_17 : f32 to vector<16x16xf32>
    %42 = arith.addf %40, %41 : vector<16x16xf32>
    %43 = arith.addf %42, %35 : vector<16x16xf32>
    %44 = math.exp %43 : vector<16x16xf32>
    %cst_18 = arith.constant 1.000000e+00 : f32
    %45 = vector.broadcast %cst_18 : f32 to vector<16x16xf32>
    %46 = arith.addf %22, %45 : vector<16x16xf32>
    %47 = arith.mulf %22, %46 : vector<16x16xf32>
    %cst_19 = arith.constant 2.000000e+00 : f32
    %48 = vector.broadcast %cst_19 : f32 to vector<16x16xf32>
    %49 = arith.addf %22, %48 : vector<16x16xf32>
    %50 = arith.mulf %47, %49 : vector<16x16xf32>
    %cst_20 = arith.constant 3.000000e+00 : f32
    %51 = vector.broadcast %cst_20 : f32 to vector<16x16xf32>
    %52 = arith.addf %22, %51 : vector<16x16xf32>
    %53 = arith.mulf %50, %52 : vector<16x16xf32>
    %54 = arith.divf %44, %53 : vector<16x16xf32>
    %55 = arith.mulf %7, %54 : vector<16x16xf32>
    %56 = arith.subf %20, %55 : vector<16x16xf32>
    %57 = vector.shape_cast %56 : vector<16x16xf32> to vector<1x16x16xf32>
    %cst_21 = arith.constant dense<0.000000e+00> : vector<1xf32>
    %58 = vector.multi_reduction <add>, %57, %cst_21 [1, 2] : vector<1x16x16xf32> to vector<1xf32>
    %59 = vector.shape_cast %58 : vector<1xf32> to vector<1x1x1xf32>
    %60 = vector.extract %59[0, 0, 0] : f32 from vector<1x1x1xf32>
    %c0_22 = arith.constant 0 : index
    %c0_23 = arith.constant 0 : index
    %61 = vector.load %arg2[%c0_22, %c0_23] : memref<16x16xf32, #tpu.memory_space<vmem>>, vector<16x16xf32>
    %cst_24 = arith.constant 1.000000e+00 : f32
    %62 = vector.broadcast %cst_24 : f32 to vector<16x16xf32>
    %63 = arith.subf %62, %61 : vector<16x16xf32>
    %cst_25 = arith.constant 2.200000e-16 : f32
    %64 = vector.broadcast %cst_25 : f32 to vector<16x16xf32>
    %65 = arith.maximumf %63, %64 : vector<16x16xf32>
    %66 = math.log %65 : vector<16x16xf32>
    %cst_26 = arith.constant 0.000000e+00 : f32
    %67 = vector.broadcast %cst_26 : f32 to vector<16x16xf32>
    %68 = arith.subf %67, %66 : vector<16x16xf32>
    %69 = math.log %68 : vector<16x16xf32>
    %70 = arith.mulf %69, %9 : vector<16x16xf32>
    %71 = math.exp %70 : vector<16x16xf32>
    %72 = arith.mulf %7, %71 : vector<16x16xf32>
    %73 = tpu.iota {dimensions = array<i32: 0>} : vector<16x1xi32>
    %c8_i32 = arith.constant 8 : i32
    %c0_i32 = arith.constant 0 : i32
    %74 = arith.cmpi eq, %c8_i32, %c0_i32 : i32
    %c1_i32 = arith.constant 1 : i32
    %75 = arith.select %74, %c1_i32, %c8_i32 : i32
    %76 = vector.broadcast %75 : i32 to vector<16x1xi32>
    %77 = arith.remsi %73, %76 : vector<16x1xi32>
    %c0_i32_27 = arith.constant 0 : i32
    %78 = vector.broadcast %c0_i32_27 : i32 to vector<16x1xi32>
    %79 = arith.cmpi ne, %77, %78 : vector<16x1xi32>
    %c0_i32_28 = arith.constant 0 : i32
    %80 = vector.broadcast %c0_i32_28 : i32 to vector<16x1xi32>
    %81 = arith.cmpi slt, %77, %80 : vector<16x1xi32>
    %c0_i32_29 = arith.constant 0 : i32
    %82 = arith.cmpi slt, %75, %c0_i32_29 : i32
    %83 = vector.broadcast %82 : i1 to vector<16x1xi1>
    %84 = vector.broadcast %83 : vector<16x1xi1> to vector<16x1xi1>
    %85 = arith.xori %81, %84 : vector<16x1xi1>
    %86 = arith.andi %85, %79 : vector<16x1xi1>
    %87 = vector.broadcast %75 : i32 to vector<16x1xi32>
    %88 = arith.addi %77, %87 : vector<16x1xi32>
    %89 = arith.select %86, %88, %77 : vector<16x1xi1>, vector<16x1xi32>
    %c0_i32_30 = arith.constant 0 : i32
    %90 = vector.broadcast %c0_i32_30 : i32 to vector<16x1xi32>
    %91 = arith.cmpi eq, %89, %90 : vector<16x1xi32>
    %c1_i32_31 = arith.constant 1 : i32
    %92 = tpu.dynamic_rotate %72 by %c1_i32_31 dim 0 : vector<16x16xf32>, i32 -> vector<16x16xf32>
    %cst_32 = arith.constant 0.000000e+00 : f32
    %93 = vector.shape_cast %91 : vector<16x1xi1> to vector<16x1xi1>
    %94 = vector.broadcast %93 : vector<16x1xi1> to vector<16x16xi1>
    %95 = vector.broadcast %cst_32 : f32 to vector<16x16xf32>
    %96 = arith.select %94, %95, %92 : vector<16x16xi1>, vector<16x16xf32>
    %c7_i32 = arith.constant 7 : i32
    %97 = vector.broadcast %c7_i32 : i32 to vector<16x1xi32>
    %98 = arith.cmpi eq, %89, %97 : vector<16x1xi32>
    %c15_i32 = arith.constant 15 : i32
    %99 = tpu.dynamic_rotate %72 by %c15_i32 dim 0 : vector<16x16xf32>, i32 -> vector<16x16xf32>
    %cst_33 = arith.constant 0.000000e+00 : f32
    %100 = vector.shape_cast %98 : vector<16x1xi1> to vector<16x1xi1>
    %101 = vector.broadcast %100 : vector<16x1xi1> to vector<16x16xi1>
    %102 = vector.broadcast %cst_33 : f32 to vector<16x16xf32>
    %103 = arith.select %101, %102, %99 : vector<16x16xi1>, vector<16x16xf32>
    %c0_34 = arith.constant 0 : index
    %c0_35 = arith.constant 0 : index
    %104 = vector.load %arg3[%c0_34, %c0_35] : memref<16x48xf32, #tpu.memory_space<vmem>>, vector<16x48xf32>
    %105 = vector.extract_strided_slice %104 {offsets = [0, 0], sizes = [16, 16], strides = [1, 1]} : vector<16x48xf32> to vector<16x16xf32>
    %106 = arith.mulf %96, %105 : vector<16x16xf32>
    %107 = vector.extract_strided_slice %104 {offsets = [0, 16], sizes = [16, 16], strides = [1, 1]} : vector<16x48xf32> to vector<16x16xf32>
    %108 = arith.mulf %72, %107 : vector<16x16xf32>
    %109 = arith.addf %106, %108 : vector<16x16xf32>
    %110 = vector.extract_strided_slice %104 {offsets = [0, 32], sizes = [16, 16], strides = [1, 1]} : vector<16x48xf32> to vector<16x16xf32>
    %111 = arith.mulf %103, %110 : vector<16x16xf32>
    %112 = arith.addf %109, %111 : vector<16x16xf32>
    %cst_36 = arith.constant dense<0.000000e+00> : vector<16xf32>
    %113 = vector.multi_reduction <add>, %112, %cst_36 [1] : vector<16x16xf32> to vector<16xf32>
    %114 = vector.shape_cast %113 : vector<16xf32> to vector<16x1xf32>
    %c0_37 = arith.constant 0 : index
    %c0_38 = arith.constant 0 : index
    %115 = vector.load %arg6[%c0_37, %c0_38] : memref<1x48xf32, #tpu.memory_space<vmem>>, vector<1x48xf32>
    %116 = vector.extract_strided_slice %115 {offsets = [0, 0], sizes = [1, 16], strides = [1, 1]} : vector<1x48xf32> to vector<1x16xf32>
    %117 = vector.broadcast %116 : vector<1x16xf32> to vector<16x16xf32>
    %118 = arith.mulf %96, %117 : vector<16x16xf32>
    %119 = vector.extract_strided_slice %115 {offsets = [0, 16], sizes = [1, 16], strides = [1, 1]} : vector<1x48xf32> to vector<1x16xf32>
    %120 = vector.broadcast %119 : vector<1x16xf32> to vector<16x16xf32>
    %121 = arith.mulf %72, %120 : vector<16x16xf32>
    %122 = arith.addf %118, %121 : vector<16x16xf32>
    %123 = vector.extract_strided_slice %115 {offsets = [0, 32], sizes = [1, 16], strides = [1, 1]} : vector<1x48xf32> to vector<1x16xf32>
    %124 = vector.broadcast %123 : vector<1x16xf32> to vector<16x16xf32>
    %125 = arith.mulf %103, %124 : vector<16x16xf32>
    %126 = arith.addf %122, %125 : vector<16x16xf32>
    %127 = vector.shape_cast %126 : vector<16x16xf32> to vector<1x16x16xf32>
    %cst_39 = arith.constant dense<0.000000e+00> : vector<1xf32>
    %128 = vector.multi_reduction <add>, %127, %cst_39 [1, 2] : vector<1x16x16xf32> to vector<1xf32>
    %129 = vector.shape_cast %128 : vector<1xf32> to vector<1x1x1xf32>
    %130 = vector.extract %129[0, 0, 0] : f32 from vector<1x1x1xf32>
    %cst_40 = arith.constant 2.200000e-16 : f32
    %131 = vector.broadcast %cst_40 : f32 to vector<16x1xf32>
    %132 = arith.maximumf %114, %131 : vector<16x1xf32>
    %133 = math.log %132 : vector<16x1xf32>
    %134 = vector.shape_cast %133 : vector<16x1xf32> to vector<1x16x1xf32>
    %cst_41 = arith.constant dense<0.000000e+00> : vector<1xf32>
    %135 = vector.multi_reduction <add>, %134, %cst_41 [1, 2] : vector<1x16x1xf32> to vector<1xf32>
    %136 = vector.shape_cast %135 : vector<1xf32> to vector<1x1x1xf32>
    %137 = vector.extract %136[0, 0, 0] : f32 from vector<1x1x1xf32>
    %138 = arith.subf %137, %130 : f32
    %139 = tpu.iota {dimensions = array<i32: 1>} : vector<1x8x128xi32>
    %140 = tpu.iota {dimensions = array<i32: 2>} : vector<1x8x128xi32>
    %c0_i32_42 = arith.constant 0 : i32
    %141 = vector.broadcast %c0_i32_42 : i32 to vector<1x8x128xi32>
    %142 = arith.cmpi eq, %139, %141 : vector<1x8x128xi32>
    %c0_i32_43 = arith.constant 0 : i32
    %143 = vector.broadcast %c0_i32_43 : i32 to vector<1x8x128xi32>
    %144 = arith.cmpi eq, %140, %143 : vector<1x8x128xi32>
    %145 = arith.andi %142, %144 : vector<1x8x128xi1>
    %cst_44 = arith.constant 0.000000e+00 : f32
    %146 = vector.broadcast %60 : f32 to vector<1x8x128xf32>
    %147 = vector.broadcast %cst_44 : f32 to vector<1x8x128xf32>
    %148 = arith.select %145, %146, %147 : vector<1x8x128xi1>, vector<1x8x128xf32>
    %c1_i32_45 = arith.constant 1 : i32
    %149 = vector.broadcast %c1_i32_45 : i32 to vector<1x8x128xi32>
    %150 = arith.cmpi eq, %140, %149 : vector<1x8x128xi32>
    %151 = arith.andi %142, %150 : vector<1x8x128xi1>
    %cst_46 = arith.constant 0.000000e+00 : f32
    %152 = vector.broadcast %138 : f32 to vector<1x8x128xf32>
    %153 = vector.broadcast %cst_46 : f32 to vector<1x8x128xf32>
    %154 = arith.select %151, %152, %153 : vector<1x8x128xi1>, vector<1x8x128xf32>
    %155 = arith.addf %148, %154 : vector<1x8x128xf32>
    %c0_47 = arith.constant 0 : index
    %c0_48 = arith.constant 0 : index
    %c0_49 = arith.constant 0 : index
    %156 = vector.load %arg7[%c0_47, %c0_48, %c0_49] : memref<1x8x128xf32, #tpu.memory_space<vmem>>, vector<1x8x128xf32>
    tpu.vector_store %arg7[%c0_47, %c0_48, %c0_49], %155 {strides = array<i32>} : memref<1x8x128xf32, #tpu.memory_space<vmem>>, vector<1x8x128xf32>,
    return
  }
  func.func @transform_0(%arg0: i32) -> (i32, i32) {
    %c0_i32 = arith.constant 0 : i32
    %c0_i32_0 = arith.constant 0 : i32
    return %arg0, %c0_i32 : i32, i32
  }
  func.func @transform_1(%arg0: i32) -> (i32, i32) {
    %c0_i32 = arith.constant 0 : i32
    %c0_i32_0 = arith.constant 0 : i32
    return %arg0, %c0_i32 : i32, i32
  }
  func.func @transform_2(%arg0: i32) -> (i32, i32) {
    %c0_i32 = arith.constant 0 : i32
    %c0_i32_0 = arith.constant 0 : i32
    return %arg0, %c0_i32 : i32, i32
  }
  func.func @transform_3(%arg0: i32) -> (i32, i32) {
    %c0_i32 = arith.constant 0 : i32
    %c0_i32_0 = arith.constant 0 : i32
    %c0_i32_1 = arith.constant 0 : i32
    return %c0_i32, %c0_i32_0 : i32, i32
  }
  func.func @transform_4(%arg0: i32) -> (i32, i32) {
    %c0_i32 = arith.constant 0 : i32
    %c0_i32_0 = arith.constant 0 : i32
    %c0_i32_1 = arith.constant 0 : i32
    return %c0_i32, %c0_i32_0 : i32, i32
  }
  func.func @transform_5(%arg0: i32) -> (i32, i32) {
    %c0_i32 = arith.constant 0 : i32
    %c0_i32_0 = arith.constant 0 : i32
    %c0_i32_1 = arith.constant 0 : i32
    return %c0_i32, %c0_i32_0 : i32, i32
  }
  func.func @transform_6(%arg0: i32) -> (i32, i32, i32) {
    %c0_i32 = arith.constant 0 : i32
    %c0_i32_0 = arith.constant 0 : i32
    %c0_i32_1 = arith.constant 0 : i32
    return %arg0, %c0_i32, %c0_i32_0 : i32, i32, i32
  }
}

</mosaic_0001>

<bundles_post_ra>
// kernel: vae_elbo_loss.1
= control target key start
LH: loop header
LB: loop body
LE: loop exit
PB: predicated region body
PF: predicated region fallthrough
CT: control target
= control target key end

     0   :  { %s939_s21 = smov 0   ;;  %s1066_s0 = inlined_call_operand.vmem [shape: f32[64,32], index: 0, kind: input, shape index: {}]   ;;  %s1067_s1 = inlined_call_operand.vmem [shape: f32[64,16], index: 1, kind: input, shape index: {}]   ;;  %s1068_s2 = inlined_call_operand.vmem [shape: f32[64,48], index: 2, kind: input, shape index: {}]   ;;  %s1069_s3 = inlined_call_operand.vmem [shape: f32[32,32], index: 3, kind: input, shape index: {}]   ;;  %s1070_s4 = inlined_call_operand.vmem [shape: f32[1,32], index: 4, kind: input, shape index: {}]   ;;  %s1071_s5 = inlined_call_operand.vmem [shape: f32[1,48], index: 5, kind: input, shape index: {}]   ;;  %s1072_s6 = inlined_call_operand.vmem [shape: f32[4,8,128], index: 6, kind: output, shape index: {}]  }
   0x1 LB: > { %s945_s22 = sadd.s32 4294967295, %s899_s21   ;;  %p795_p0 = scmp.ge.s32.totalorder %s899_s21, 1  ;;  %s899_s21 = sphi %s939_s21, %s16_s21  }
   0x2   : > { %p235_p1 = scmp.lt.s32.totalorder %s899_s21, 5 }
   0x4   : > { %p236_p2 = pnand %p795_p0, %p235_p1 }
   0x5   : > { %v298_v0 = vld [vmem:[%s1069_s3] sm:$0xff] (!%p236_p2)  ;;  %v299_v1 = vld [vmem:[%s1069_s3 + $0x8] sm:$0xff] (!%p236_p2)  ;;  %v300_v2 = vld [vmem:[%s1069_s3 + $0x10] sm:$0xff] (!%p236_p2)  ;;  %s796_s29 = sshll.u32 (!%p236_p2), %s945_s22, 1  ;;  %vm309_vm0 = vcmask (!%p236_p2), 261120   ;;  %s901_s17 = smov (!%p236_p2), 16  }
   0x6   : > { %239 = sbr.rel (%p236_p2) target bundleno = 939 (0x3ab), region = 44  ;;  %v828_v3 = vpack.c.bf16 (!%p236_p2), %v299_v1, %v298_v0  ;;  %v301_v4 = vld [vmem:[%s1069_s3 + $0x18] sm:$0xff] (!%p236_p2)  ;;  %p275_p3 = scmp.lt.s32.totalorder (!%p236_p2), %s796_s29, 7  ;;  %v803_v20 = vld [vmem:[%s1070_s4] ss:$0 sm:$0xff] (!%p236_p2)  ;;  %vm501_vm6 = vcmask (!%p236_p2), 130048  }
   0x7   : > { %v832_v5 = vpack.c.bf16 (!%p236_p2), %v301_v4, %v300_v2  ;;  %s902_s23 = smov (!%p236_p2), 112   ;;  %s903_s24 = smov (!%p236_p2), 96   ;;  %vm687_vm8 = vcmask (!%p236_p2), 7168  }
   0x8   : > { %829 = vmatprep.subr.bf16.mxu0 (!%p236_p2), %v828_v3  ;;  %p292_p4 = scmp.lt.s32.totalorder (!%p236_p2), %s945_s22, 3 }
   0x9   : > { %831 = vmatpush3.bf16.msra.mxu0 (!%p236_p2), %v828_v3 }
   0xa   : > { %833 = vmatprep.subr.bf16.mxu0 (!%p236_p2), %v832_v5 }
   0xd   : > { %s1074_s29 = smov (!%p275_p3, %s796_s29), 7  ;;  %835 = vmatpush3.bf16.msra.mxu0 %v832_v5  ;;  %s1076_s22 = smov (!%p292_p4, %s945_s22), 3 }
   0xe   : > { %s962_s8 = sshll.u32 %s1074_s29, 3  ;;  %s802_s30 = sshll.u32 %s1076_s22, 3 }
   0xf   : > { %s278_s11 = scalar_lea.vmem %s1066_s0, %s962_s8  ;;  %s284_s14 = scalar_lea.vmem %s1067_s1, %s962_s8 }
  0x10   : > { %v296_v6 = vld [vmem:[%s278_s11] sm:$0xff]  ;;  %v297_v7 = vld [vmem:[%s278_s11 + $0x8] sm:$0xff]  ;;  %s290_s20 = scalar_lea.vmem %s1068_s2, %s962_s8  ;;  %s295_s10 = scalar_lea.vmem %s1072_s6, %s802_s30 }
  0x11   : > { %825 = vmatprep.mubr.msk.f32.mxu0 %vm309_vm0, %v296_v6  ;;  %v514_v8 = vld [vmem:[%s284_s14] sm:$0xff]  ;;  %v515_v9 = vld [vmem:[%s284_s14 + $0x8] sm:$0xff] }
  0x12   : > { %826 = vmatmul.mubr.msk.f32.vlgmr.msra.gmra.mrb[0].mxu0 %vm309_vm0, %v297_v7  ;;  %v516_v10 = vsub.f32 1.0, %v514_v8  ;;  %v517_v11 = vsub.f32 1.0, %v515_v9 }
  0x14   : > { %v518_v12 = vmax.f32 %v516_v10, 2.2e-16  ;;  %v519_v13 = vmax.f32 %v517_v11, 2.2e-16  ;;  %v995_v10 = vld [vmem:[%s290_s20] sm:$0xff] }
  0x16   : > { %853 = vlog2.f32 %v518_v12 }
  0x17   : > { %855 = vlog2.f32 %v519_v13 }
  0x20   : > { %v854_v14 = vpop.eup %853 }
  0x21   : > { %v856_v15 = vpop.eup %855  ;;  %v521_v16 = vmul.f32 0.6931472, %v854_v14 }
  0x22   : > { %v523_v17 = vmul.f32 0.6931472, %v856_v15 }
  0x23   : > { %v524_v18 = vsub.f32 0.0, %v521_v16 }
  0x24   : > { %v525_v19 = vsub.f32 0.0, %v523_v17 }
  0x25   : > { %857 = vlog2.f32 %v524_v18 }
  0x26   : > { %859 = vlog2.f32 %v525_v19 }
  0x2f   : > { %v858_v25 = vpop.eup %857 }
  0x30   : > { %v860_v26 = vpop.eup %859  ;;  %v527_v28 = vmul.f32 0.6931472, %v858_v25 }
  0x31   : > { %v529_v27 = vmul.f32 0.6931472, %v860_v26  ;;  %v1004_v26 = vld [vmem:[%s290_s20 + $0x8] sm:$0xff] }
  0xe5   : > { %v827_v21 = vpop.f32.mrb[0].mxu0 }
  0xe6   : > { %v975_v22 = vadd.f32 %v827_v21, %v803_v20  ;;  %v382_v23 = vpop.f32.mrb[1].mxu0 }
  0xe7   : > { %v977_v24 = vadd.f32 %v803_v20, %v382_v23 }
  0xe8   : > { %861 = vrcp.f32 %v975_v22 }
  0xe9   : > { %863 = vrcp.f32 %v977_v24 }
  0xf2   : > { %v981_v29 = vpop.eup %861 }
  0xf3   : > { %v983_v30 = vpop.eup %863  ;;  %v531_v32 = vmul.f32 %v981_v29, %v529_v27  ;;  %v428_v39 = vadd.f32 1.0, %v981_v29 }
  0xf4   : > { %v530_v31 = vmul.f32 %v983_v30, %v527_v28  ;;  %v427_v37 = vadd.f32 1.0, %v983_v30 }
  0xf5   : > { %v534_v34 = vmul.f32 1.442695, %v531_v32  ;;  %v430_v40 = vadd.f32 4.0, %v428_v39  ;;  %v466_v8 = vadd.f32 1.0, %v428_v39  ;;  %v470_v19 = vadd.f32 2.0, %v428_v39 }
  0xf6   : > { %v532_v33 = vmul.f32 1.442695, %v530_v31  ;;  %v429_v38 = vadd.f32 4.0, %v427_v37  ;;  %v465_v56 = vadd.f32 1.0, %v427_v37  ;;  %v469_v1 = vadd.f32 2.0, %v427_v37 }
  0xf7   : > { %v807_v63 = vadd.f32 -0.5, %v430_v40  ;;  %v473_v6 = vadd.f32 3.0, %v427_v37  ;;  %v468_v15 = vmul.f32 %v466_v8, %v428_v39  ;;  %v474_v25 = vadd.f32 3.0, %v428_v39 }
  0xf8   : > { %865 = vpow2.f32 %v532_v33  ;;  %v806_v50 = vadd.f32 -0.5, %v429_v38  ;;  %v467_v61 = vmul.f32 %v465_v56, %v427_v37 }
  0xf9   : > { %867 = vpow2.f32 %v534_v34  ;;  %v472_v21 = vmul.f32 %v470_v19, %v468_v15 }
  0xfa   : > { %869 = vrcp.f32 %v429_v38  ;;  %v471_v3 = vmul.f32 %v469_v1, %v467_v61 }
  0xfb   : > { %871 = vlog2.f32 %v429_v38  ;;  %v476_v27 = vmul.f32 %v474_v25, %v472_v21 }
  0xfc   : > { %873 = vrcp.f32 %v430_v40  ;;  %v475_v11 = vmul.f32 %v473_v6, %v471_v3 }
  0xfd   : > { %875 = vlog2.f32 %v430_v40 }
 0x102   : > { %v866_v35 = vpop.eup %865 }
 0x103   : > { %538 = vrot.lane.b32.xlu0 %v866_v35, %s901_s17  ;;  %v868_v36 = vpop.eup %867 }
 0x104   : > { %v870_v41 = vpop.eup %869 }
 0x105   : > { %v435_v42 = vmul.f32 %v870_v41, %v870_v41  ;;  %v872_v44 = vpop.eup %871 }
 0x106   : > { %v874_v45 = vpop.eup %873  ;;  %v450_v47 = vmul.f32 0.6931472, %v872_v44 }
 0x107   : > { %540 = vrot.lane.b32.xlu0 %v868_v36, %s901_s17  ;;  %v437_v43 = vmul.f32 0.0007936508, %v435_v42  ;;  %v436_v48 = vmul.f32 %v874_v45, %v874_v45  ;;  %v876_v54 = vpop.eup %875 }
 0x108   : > { %v453_v51 = vmul.f32 %v806_v50, %v450_v47  ;;  %v452_v59 = vmul.f32 0.6931472, %v876_v54 }
 0x109   : > { %v439_v46 = vadd.f32 -0.0027777778, %v437_v43  ;;  %v438_v52 = vmul.f32 0.0007936508, %v436_v48 }
 0x10a   : > { %v455_v55 = vsub.f32 %v453_v51, %v429_v38  ;;  %v454_v2 = vmul.f32 %v807_v63, %v452_v59  ;;  %v808_v51 = vld [vmem:[%s1071_s5] ss:$0 sm:$0xff] }
 0x10b   : > { %v441_v49 = vmul.f32 %v439_v46, %v435_v42  ;;  %v440_v57 = vadd.f32 -0.0027777778, %v438_v52 }
 0x10c   : > { %v457_v60 = vadd.f32 0.9189385, %v455_v55  ;;  %v456_v7 = vsub.f32 %v454_v2, %v430_v40  ;;  %v546_v55 = vlaneseq }
 0x10d   : > { %v443_v53 = vadd.f32 0.083333336, %v441_v49  ;;  %v442_v62 = vmul.f32 %v440_v57, %v436_v48 }
 0x10e   : > { %v458_v14 = vadd.f32 0.9189385, %v456_v7  ;;  %v1027_v57 = vshrl.u32 %v546_v55, 7 }
 0x10f   : > { %v445_v58 = vmul.f32 %v870_v41, %v443_v53  ;;  %v444_v4 = vadd.f32 0.083333336, %v442_v62 }
 0x110   : > { %vm585_vm1 = vcmp.lt.s32.totalorder %v1027_v57, 1  ;;  %vm598_vm3 = vcmp.lt.s32.totalorder %v1027_v57, 7  ;;  %v548_v1 = vadd.s32 8, %v1027_v57  ;;  %vm703_vm9 = vcmp.eq.s32.totalorder %v1027_v57, 0 }
 0x111   : > { %v459_v0 = vadd.f32 %v457_v60, %v445_v58  ;;  %v446_v12 = vmul.f32 %v874_v45, %v444_v4  ;;  %v553_v58 = vand.u32 7, %v1027_v57 }
 0x112   : > { %v560_v4 = vand.u32 7, %v548_v1 }
 0x113   : > { %v461_v5 = vmul.f32 1.442695, %v459_v0  ;;  %v460_v18 = vadd.f32 %v458_v14, %v446_v12  ;;  %vm573_vm2 = vcmp.eq.s32.totalorder %v553_v58, 0  ;;  %vm594_vm4 = vcmp.eq.s32.totalorder %v553_v58, 7 }
 0x114   : > { %vm574_vm5 = vcmp.eq.s32.totalorder %v560_v4, 0  ;;  %vm595_vm7 = vcmp.eq.s32.totalorder %v560_v4, 7 }
 0x115   : > { %877 = vpow2.f32 %v461_v5  ;;  %v463_v23 = vmul.f32 1.442695, %v460_v18 }
 0x116   : > { %879 = vrcp.f32 %v475_v11 }
 0x117   : > { %881 = vpow2.f32 %v463_v23 }
 0x118   : > { %883 = vrcp.f32 %v476_v27 }
 0x11f   : > { %v878_v28 = vpop.eup %877 }
 0x120   : > { %v880_v32 = vpop.eup %879 }
 0x121   : > { %v478_v33 = vmul.f32 %v880_v32, %v878_v28  ;;  %v882_v34 = vpop.eup %881 }
 0x122   : > { %v884_v35 = vpop.eup %883 }
 0x123   : > { %v480_v36 = vmul.f32 %v884_v35, %v882_v34 }
 0x175   : > { %v539_v9 = vpop.permute.xlu0 %538 }
 0x176   : > { %v544_v13 = vmul.f32 %v539_v9, %v977_v24 }
 0x178   : > { %v611_v16 = vmul.f32 %v995_v10, %v544_v13  ;;  %v650_v52 = vmul.f32 %v808_v51, %v544_v13 }
 0x179   : > { %v541_v17 = vpop.permute.xlu0 %540 }
 0x17a   : > { %v545_v20 = vmul.f32 %v541_v17, %v975_v22  ;;  %615 = vrot.lane.b32.xlu0 %v611_v16, %s902_s23 }
 0x17c   : > { %579 = vrot.lane.b32.xlu1 %v545_v20, %s902_s23  ;;  %v612_v31 = vmul.f32 %v1004_v26, %v545_v20  ;;  %v651_v56 = vmul.f32 %v808_v51, %v545_v20 }
 0x17e   : > { %625 = vrot.lane.b32.xlu0 %v995_v10, %s903_s24 }
 0x180   : > { %577 = vrot.lane.b32.xlu1 %v544_v13, %s902_s23 }
 0x182   : > { %401 = vrot.lane.b32.xlu0 %v983_v30, %s901_s17 }
 0x184   : > { %617 = vrot.lane.b32.xlu1 %v612_v31, %s902_s23 }
 0x186   : > { %483 = vrot.lane.b32.xlu0 %v478_v33, %s901_s17 }
 0x188   : > { %627 = vrot.lane.b32.xlu1 %v1004_v26, %s903_s24 }
 0x18c   : > { %403 = vrot.lane.b32.xlu1 %v981_v29, %s901_s17 }
 0x190   : > { %485 = vrot.lane.b32.xlu1 %v480_v36, %s901_s17 }
 0x1ec   : > { %v616_v37 = vpop.permute.xlu0 %615 }
 0x1ee   : > { %v580_v38 = vpop.permute.xlu1 %579 }
 0x1ef   : > { %v584_v60 = vrot.slane %v580_v38, 7  ;;  %v597_v0 = vrot.slane %v580_v38, 1 }
 0x1f0   : > { %v626_v39 = vpop.permute.xlu0 %625 }
 0x1f2   : > { %v578_v40 = vpop.permute.xlu1 %577 }
 0x1f3   : > { %v583_v59 = vrot.slane %v578_v40, 7  ;;  %v596_v62 = vrot.slane %v578_v40, 1 }
 0x1f4   : > { %v402_v41 = vpop.permute.xlu0 %401 }
 0x1f5   : > { %v407_v42 = vmul.f32 %v402_v41, %v977_v24  ;;  %v587_v61 = vsel %vm585_vm1, %v584_v60, %v583_v59  ;;  %v599_v2 = vsel %vm598_vm3, %v596_v62, %v597_v0  ;;  %v586_v8 = vsel %vm585_vm1, %v583_v59, %v584_v60 }
 0x1f6   : > { %v618_v43 = vpop.permute.xlu1 %617  ;;  %v592_v63 = vsel %vm573_vm2, 0.0, %v587_v61  ;;  %v605_v5 = vsel %vm594_vm4, 0.0, %v599_v2  ;;  %v593_v11 = vsel %vm574_vm5, 0.0, %v586_v8  ;;  %v600_v12 = vsel %vm598_vm3, %v597_v0, %v596_v62 }
 0x1f7   : > { %v409_v44 = vmax.f32 %v407_v42, 2.2e-16  ;;  %v609_v3 = vmul.f32 %v995_v10, %v592_v63  ;;  %v631_v7 = vmul.f32 %v626_v39, %v605_v5  ;;  %v610_v14 = vmul.f32 %v1004_v26, %v593_v11 }
 0x1f8   : > { %v606_v10 = vsel %vm595_vm7, 0.0, %v600_v12  ;;  %v484_v21 = vpop.permute.xlu0 %483  ;;  %v648_v28 = vmul.f32 %v808_v51, %v592_v63  ;;  %v649_v34 = vmul.f32 %v808_v51, %v593_v11  ;;  %v396_v41 = vsub.f32 1.0, %v981_v29 }
 0x1f9   : > { %885 = vlog2.f32 %v409_v44  ;;  %v621_v6 = vadd.f32 %v616_v37, %v609_v3  ;;  %v622_v16 = vadd.f32 %v618_v43, %v610_v14  ;;  %v489_v23 = vmul.f32 %v484_v21, %v977_v24 }
 0x1fa   : > { %v628_v45 = vpop.permute.xlu1 %627  ;;  %v395_v43 = vsub.f32 1.0, %v983_v30  ;;  %v398_v44 = vmul.f32 0.5772, %v396_v41 }
 0x1fb   : > { %v633_v9 = vadd.f32 %v631_v7, %v621_v6  ;;  %v632_v15 = vmul.f32 %v628_v45, %v606_v10 }
 0x1fd   : > { %v635_v13 = vsel %vm501_vm6, %v633_v9, 0.0  ;;  %v634_v17 = vadd.f32 %v632_v15, %v622_v16 }
 0x1fe   : > { %v404_v46 = vpop.permute.xlu1 %403 }
 0x1ff   : > { %v408_v47 = vmul.f32 %v404_v46, %v975_v22  ;;  %v638_v18 = vsel %vm501_vm6, %v634_v17, 0.0  ;;  %v397_v46 = vmul.f32 0.5772, %v395_v43 }
 0x201   : > { %v410_v48 = vmax.f32 %v408_v47, 2.2e-16 }
 0x202   : > { %v486_v19 = vpop.permute.xlu1 %485 }
 0x203   : > { %v886_v49 = vpop.eup %885  ;;  %887 = vlog2.f32 %v410_v48  ;;  %v490_v20 = vmul.f32 %v486_v19, %v975_v22 }
 0x204   : > { %v412_v50 = vmul.f32 0.6931472, %v886_v49 }
 0x206   : > { %417 = vrot.lane.b32.xlu0 %v412_v50, %s902_s23 }
 0x20a   : > { %662 = vrot.lane.b32.xlu0 %v808_v51, %s903_s24 }
 0x20d   : > { %v888_v53 = vpop.eup %887 }
 0x20e   : > { %654 = vrot.lane.b32.xlu0 %v650_v52, %s902_s23  ;;  %v414_v54 = vmul.f32 0.6931472, %v888_v53 }
 0x210   : > { %419 = vrot.lane.b32.xlu1 %v414_v54, %s902_s23 }
 0x214   : > { %656 = vrot.lane.b32.xlu1 %v651_v56, %s902_s23 }
 0x22d   : > { %636 = vadd.xlane.f32.xlu0 %v635_v13 }
 0x238   : > { %639 = vadd.xlane.f32.xlu1 %v638_v18 }
 0x243   : > { %495 = vrot.lane.b32.xlu0 %v490_v20, %s902_s23 }
 0x249   : > { %493 = vrot.lane.b32.xlu1 %v489_v23, %s902_s23 }
 0x278   : > { %v418_v25 = vpop.permute.xlu0 %417 }
 0x279   : > { %v423_v48 = vadd.f32 %v418_v25, %v397_v46 }
 0x27b   : > { %v425_v53 = vadd.f32 1.0, %v423_v48 }
 0x27c   : > { %v663_v26 = vpop.permute.xlu0 %662 }
 0x27d   : > { %v665_v33 = vmul.f32 %v663_v26, %v605_v5  ;;  %v666_v36 = vmul.f32 %v663_v26, %v606_v10  ;;  %v702_v26 = vand.u32 127, %v546_v55 }
 0x27f   : > { %vm704_vm10 = vcmp.eq.s32.totalorder %v702_v26, 0  ;;  %vm708_vm11 = vcmp.eq.s32.totalorder %v702_v26, 1 }
 0x280   : > { %v655_v27 = vpop.permute.xlu0 %654  ;;  %vm705_vm12 = vmand %vm703_vm9, %vm704_vm10 }
 0x281   : > { %v660_v32 = vadd.f32 %v655_v27, %v648_v28  ;;  %vm709_vm13 = vmand %vm703_vm9, %vm708_vm11 }
 0x282   : > { %v420_v31 = vpop.permute.xlu1 %419 }
 0x283   : > { %v667_v37 = vadd.f32 %v665_v33, %v660_v32  ;;  %v424_v47 = vadd.f32 %v420_v31, %v398_v44 }
 0x285   : > { %v669_v39 = vsel %vm501_vm6, %v667_v37, 0.0  ;;  %v426_v51 = vadd.f32 1.0, %v424_v47 }
 0x286   : > { %v657_v35 = vpop.permute.xlu1 %656 }
 0x287   : > { %v661_v38 = vadd.f32 %v657_v35, %v649_v34 }
 0x289   : > { %v668_v22 = vadd.f32 %v666_v36, %v661_v38 }
 0x28b   : > { %v670_v40 = vsel %vm501_vm6, %v668_v22, 0.0 }
 0x28c   : > { %v671_v24 = vadd.f32 %v670_v40, %v669_v39 }
 0x28e   : > { %672 = vadd.xlane.f32.xlu0 %v671_v24 }
 0x2ba   : > { %v637_v42 = vpop.xlane.xlu0 %636 }
 0x2bb   : > { %v681_v45 = vmax.f32 %v637_v42, 2.2e-16 }
 0x2bd   : > { %889 = vlog2.f32 %v681_v45 }
 0x2be   : > { %v496_v49 = vpop.permute.xlu0 %495 }
 0x2bf   : > { %v500_v54 = vsub.f32 %v426_v51, %v496_v49 }
 0x2c1   : > { %v503_v59 = vsel %vm501_vm6, %v500_v54, 0.0 }
 0x2c5   : > { %v640_v50 = vpop.xlane.xlu1 %639 }
 0x2c6   : > { %v682_v52 = vmax.f32 %v640_v50, 2.2e-16 }
 0x2c7   : > { %v890_v60 = vpop.eup %889 }
 0x2c8   : > { %891 = vlog2.f32 %v682_v52  ;;  %v684_v61 = vmul.f32 0.6931472, %v890_v60 }
 0x2c9   : > { %v494_v56 = vpop.permute.xlu1 %493 }
 0x2ca   : > { %v499_v58 = vsub.f32 %v425_v53, %v494_v56  ;;  %v688_v0 = vsel %vm687_vm8, %v684_v61, 0.0 }
 0x2cc   : > { %v502_v29 = vsel %vm501_vm6, %v499_v58, 0.0 }
 0x2cd   : > { %v504_v30 = vadd.f32 %v503_v59, %v502_v29 }
 0x2cf   : > { %505 = vadd.xlane.f32.xlu1 %v504_v30 }
 0x2d2   : > { %v892_v62 = vpop.eup %891 }
 0x2d3   : > { %v686_v63 = vmul.f32 0.6931472, %v892_v62 }
 0x2d5   : > { %v689_v1 = vsel %vm687_vm8, %v686_v63, 0.0 }
 0x2d6   : > { %v690_v2 = vadd.f32 %v689_v1, %v688_v0 }
 0x2d8   : > { %691 = vadd.xlane.f32.xlu0 %v690_v2 }
 0x31b   : > { %v673_v3 = vpop.xlane.xlu0 %672 }
 0x31c   : > { %v674_v4 = vrot.slane %v673_v3, 4 }
 0x31e   : > { %v675_v5 = vadd.f32 %v674_v4, %v673_v3 }
 0x320   : > { %v676_v6 = vrot.slane %v675_v5, 2 }
 0x322   : > { %v677_v11 = vadd.f32 %v676_v6, %v675_v5 }
 0x324   : > { %v678_v14 = vrot.slane %v677_v11, 1 }
 0x326   : > { %v679_v19 = vadd.f32 %v678_v14, %v677_v11 }
 0x35c   : > { %v506_v7 = vpop.xlane.xlu1 %505 }
 0x35d   : > { %v507_v8 = vrot.slane %v506_v7, 4 }
 0x35f   : > { %v508_v9 = vadd.f32 %v507_v8, %v506_v7 }
 0x361   : > { %v509_v12 = vrot.slane %v508_v9, 2 }
 0x363   : > { %v510_v13 = vadd.f32 %v509_v12, %v508_v9 }
 0x365   : > { %v692_v10 = vpop.xlane.xlu0 %691  ;;  %v511_v15 = vrot.slane %v510_v13, 1 }
 0x366   : > { %v693_v16 = vrot.slane %v692_v10, 4 }
 0x367   : > { %v512_v17 = vadd.f32 %v511_v15, %v510_v13 }
 0x368   : > { %v694_v18 = vadd.f32 %v693_v16, %v692_v10 }
 0x369   : > { %836 = vpush %v512_v17 }
 0x36a   : > { %v695_v20 = vrot.slane %v694_v18, 2  ;;  %838 = vpush %v679_v19 }
 0x36c   : > { %v696_v21 = vadd.f32 %v695_v20, %v694_v18 }
 0x36e   : > { %v697_v23 = vrot.slane %v696_v21, 1 }
 0x370   : > { %v698_v25 = vadd.f32 %v697_v23, %v696_v21 }
 0x372   : > { %840 = vpush %v698_v25 }
 0x39a   : > { %s837_s27 = spop %836 }
 0x39b   : > { %s839_s28 = spop %838  ;;  %v706_v27 = vstv %s837_s27 }
 0x39c   : > { %v707_v31 = vsel %vm705_vm12, %v706_v27, 0.0 }
 0x3a3   : > { %s841_s29 = spop %840 }
 0x3a4   : > { %s700_s7 = ssub.f32 %s841_s29, %s839_s28 }
 0x3a6   : > { %v710_v28 = vstv %s700_s7 }
 0x3a7   : > { %v711_v55 = vsel %vm709_vm13, %v710_v28, 0.0 }
 0x3a8   : > { %v712_v32 = vadd.f32 %v711_v55, %v707_v31 }
 0x3aa   : > { %713 = vst [vmem:[%s295_s10] sm:$0xff] %v712_v32 }
 0x3ab PF: > { %s16_s21 = sadd.s32 1, %s899_s21  }
 0x3ac   : > { %p13_p5 = scmp.ge.s32.totalorder %s16_s21, 6  }
 0x3ae   :  { %15 = sbr.rel (!%p13_p5) target bundleno = 1 (0x1), region = 80 }

</bundles_post_ra>
